<compile_context>
chip_gen: v6e
topology: v6e:2x2x1
jax: 0.10.0
libtpu: 0.0.40
codegen_flags: <defaults>
</compile_context>

<pallas_src>
import jax
import jax.numpy as jnp
from jax.experimental import pallas as pl
from jax.experimental.pallas import tpu as pltpu


# ---------------------------------------------------------------------------
# Pass 1: squeeze — tiled spatial sum, accumulated in f32 on-chip.
# ---------------------------------------------------------------------------
def _se_squeeze_kernel(x_ref, ysum_ref):
    # x_ref: (1, C, THW) input dtype; ysum_ref: (1, C, 1) f32 accumulator
    # (same output block across the spatial-tile axis -> stays VMEM-resident).
    @pl.when(pl.program_id(1) == 0)
    def _():
        ysum_ref[...] = jnp.zeros_like(ysum_ref)

    x = x_ref[...].astype(jnp.float32)                      # (1, C, THW)
    ysum_ref[...] += jnp.sum(x, axis=-1, keepdims=True)     # (1, C, 1)


# ---------------------------------------------------------------------------
# Pass 2: scale — pure per-channel multiply in the input dtype (HBM-bound).
# ---------------------------------------------------------------------------
def _se_scale_kernel(x_ref, s_ref, o_ref):
    # x_ref/o_ref: (1, C, THW) input dtype; s_ref: (1, C, 1) f32 gate.
    o_ref[...] = x_ref[...] * s_ref[...].astype(x_ref.dtype)


def _pick_spatial_tile(hw, c, itemsize, target_block_bytes=2 << 20):
    """Largest spatial tile that is a multiple of 128, divides hw, and keeps a
    (C, THW) block under target_block_bytes.  Falls back to the full extent
    when hw is not a multiple of 128 (full-extent blocks are always legal)."""
    if hw % 128 != 0:
        return hw
    cap = max(128, (target_block_bytes // max(1, c * itemsize)) // 128 * 128)
    best = 128
    t = 128
    while t <= min(hw, cap):
        if hw % t == 0:
            best = t
        t += 128
    return best


def se_layer(x, w1, w2, *, vmem_limit_bytes=32 * 1024 * 1024):
    """x: (B, C, H, W). w1: (C, C//r). w2: (C//r, C). Returns x scaled by the
    SE gate, same shape/dtype as x."""
    B, C, H, W = x.shape
    HW = H * W
    itemsize = jnp.dtype(x.dtype).itemsize

    x_flat = x.reshape(B, C, HW)
    thw = _pick_spatial_tile(HW, C, itemsize)
    n_t = HW // thw

    # ---- Pass 1: per-(b, c) spatial sum (f32 accumulation). ----------------
    ysum = pl.pallas_call(
        _se_squeeze_kernel,
        out_shape=jax.ShapeDtypeStruct((B, C, 1), jnp.float32),
        grid_spec=pltpu.PrefetchScalarGridSpec(
            num_scalar_prefetch=0,
            grid=(B, n_t),
            in_specs=[pl.BlockSpec((1, C, thw), lambda b, t: (b, 0, t))],
            out_specs=pl.BlockSpec((1, C, 1), lambda b, t: (b, 0, 0)),
        ),
        compiler_params=pltpu.CompilerParams(
            dimension_semantics=("parallel", "arbitrary"),
            vmem_limit_bytes=vmem_limit_bytes),
        cost_estimate=pl.CostEstimate(
            flops=B * C * HW,
            transcendentals=0,
            bytes_accessed=B * C * HW * itemsize + B * C * 4),
    )(x_flat)

    # ---- Excitation: tiny batched matmuls, once for the whole batch (JAX). -
    y = ysum[:, :, 0] * (1.0 / HW)                                   # (B, C)
    h = jnp.maximum(
        jnp.dot(y, w1.astype(jnp.float32),
                preferred_element_type=jnp.float32), 0.0)            # (B, C//r)
    s = jax.nn.sigmoid(
        jnp.dot(h, w2.astype(jnp.float32),
                preferred_element_type=jnp.float32))                 # (B, C)
    s = s.reshape(B, C, 1)

    # ---- Pass 2: tiled, multi-step, dtype-preserving scale pass. -----------
    out_flat = pl.pallas_call(
        _se_scale_kernel,
        out_shape=jax.ShapeDtypeStruct((B, C, HW), x.dtype),
        grid_spec=pltpu.PrefetchScalarGridSpec(
            num_scalar_prefetch=0,
            grid=(B, n_t),
            in_specs=[
                pl.BlockSpec((1, C, thw), lambda b, t: (b, 0, t)),
                pl.BlockSpec((1, C, 1), lambda b, t: (b, 0, 0)),
            ],
            out_specs=pl.BlockSpec((1, C, thw), lambda b, t: (b, 0, t)),
        ),
        compiler_params=pltpu.CompilerParams(
            dimension_semantics=("parallel", "parallel"),
            vmem_limit_bytes=vmem_limit_bytes),
        cost_estimate=pl.CostEstimate(
            flops=B * C * HW,
            transcendentals=0,
            bytes_accessed=2 * B * C * HW * itemsize + B * C * 4),
    )(x_flat, s)

    return out_flat.reshape(B, C, H, W)


def se_layer_ref(x, w1, w2):
    """Pure-JAX reference matching the PyTorch SELayer."""
    y = jnp.mean(x, axis=(2, 3))                 # (B, C)
    h = jnp.maximum(y @ w1, 0.0)                 # (B, C//r)
    s = jax.nn.sigmoid(h @ w2)                   # (B, C)
    return x * s[:, :, None, None]


if __name__ == "__main__":
    B, C, H, W = 2, 32, 16, 16
    reduction = 16
    C_red = max(1, C // reduction)

    key = jax.random.PRNGKey(0)
    kx, k1, k2 = jax.random.split(key, 3)

    x = jax.random.normal(kx, (B, C, H, W), dtype=jnp.float32)
    # nn.Linear(bias=False) weights, stored pre-transposed for the y @ W convention.
    w1 = jax.random.normal(k1, (C, C_red), dtype=jnp.float32) * 0.1
    w2 = jax.random.normal(k2, (C_red, C), dtype=jnp.float32) * 0.1

    out = jax.block_until_ready(se_layer(x, w1, w2))
    ref = se_layer_ref(x, w1, w2)

    assert out.shape == (B, C, H, W)
    assert out.dtype == x.dtype
    assert jnp.allclose(out, ref, rtol=1e-5, atol=1e-5), "mismatch vs reference"

    print("KERNEL_OK")
</pallas_src>

<mosaic_0001>
module attributes {stable_mosaic.version = 11 : i64} {
  func.func @_se_squeeze_kernel(%arg0: i32, %arg1: i32, %arg2: memref<1x32x256xf32, #tpu.memory_space<vmem>>, %arg3: memref<1x32x1xf32, #tpu.memory_space<vmem>>) attributes {dimension_semantics = [#tpu.dimension_semantics<parallel>, #tpu.dimension_semantics<arbitrary>], iteration_bounds = array<i64: 2, 1>, scalar_prefetch = 0 : i64, scratch_operands = 0 : i64, tpu.core_type = #tpu.core_type<tc>, window_params = [{transform_indices = @transform_0, window_bounds = array<i64: 1, 32, 256>}, {transform_indices = @transform_1, window_bounds = array<i64: 1, 32, 1>}]} {
    %c0_i32 = arith.constant 0 : i32
    %0 = arith.cmpi eq, %arg1, %c0_i32 : i32
    %1 = arith.extui %0 : i1 to i32
    %c0_i32_0 = arith.constant 0 : i32
    %2 = arith.cmpi ne, %1, %c0_i32_0 : i32
    scf.if %2 {
      %cst_9 = arith.constant 0.000000e+00 : f32
      %9 = vector.broadcast %cst_9 : f32 to vector<1x32x1xf32>
      %c0_10 = arith.constant 0 : index
      %c0_11 = arith.constant 0 : index
      %c0_12 = arith.constant 0 : index
      %10 = vector.load %arg3[%c0_10, %c0_11, %c0_12] : memref<1x32x1xf32, #tpu.memory_space<vmem>>, vector<1x32x1xf32>
      tpu.vector_store %arg3[%c0_10, %c0_11, %c0_12], %9 {strides = array<i32>} : memref<1x32x1xf32, #tpu.memory_space<vmem>>, vector<1x32x1xf32>,
    } else {
    }
    %c0 = arith.constant 0 : index
    %c0_1 = arith.constant 0 : index
    %c0_2 = arith.constant 0 : index
    %3 = vector.load %arg2[%c0, %c0_1, %c0_2] : memref<1x32x256xf32, #tpu.memory_space<vmem>>, vector<1x32x256xf32>
    %c0_3 = arith.constant 0 : index
    %c0_4 = arith.constant 0 : index
    %c0_5 = arith.constant 0 : index
    %4 = vector.load %arg3[%c0_3, %c0_4, %c0_5] : memref<1x32x1xf32, #tpu.memory_space<vmem>>, vector<1x32x1xf32>
    %cst = arith.constant dense<0.000000e+00> : vector<1x32xf32>
    %5 = vector.multi_reduction <add>, %3, %cst [2] : vector<1x32x256xf32> to vector<1x32xf32>
    %6 = vector.shape_cast %5 : vector<1x32xf32> to vector<1x32x1xf32>
    %7 = arith.addf %4, %6 : vector<1x32x1xf32>
    %c0_6 = arith.constant 0 : index
    %c0_7 = arith.constant 0 : index
    %c0_8 = arith.constant 0 : index
    %8 = vector.load %arg3[%c0_6, %c0_7, %c0_8] : memref<1x32x1xf32, #tpu.memory_space<vmem>>, vector<1x32x1xf32>
    tpu.vector_store %arg3[%c0_6, %c0_7, %c0_8], %7 {strides = array<i32>} : memref<1x32x1xf32, #tpu.memory_space<vmem>>, vector<1x32x1xf32>,
    return
  }
  func.func @transform_0(%arg0: i32, %arg1: i32) -> (i32, i32, i32) {
    %c0_i32 = arith.constant 0 : i32
    %c0_i32_0 = arith.constant 0 : i32
    return %arg0, %c0_i32, %arg1 : i32, i32, i32
  }
  func.func @transform_1(%arg0: i32, %arg1: i32) -> (i32, i32, i32) {
    %c0_i32 = arith.constant 0 : i32
    %c0_i32_0 = arith.constant 0 : i32
    %c0_i32_1 = arith.constant 0 : i32
    return %arg0, %c0_i32, %c0_i32_0 : i32, i32, i32
  }
}

</mosaic_0001>

<bundles_post_ra>
// kernel: tpu_custom_call.1
= control target key start
LH: loop header
LB: loop body
LE: loop exit
PB: predicated region body
PF: predicated region fallthrough
CT: control target
= control target key end

     0   :  { %6 = vsyncpa [#allocation3], 0  ;;  %s559_s0 = inlined_call_operand.hbm [shape: f32[2,32,256], index: 0, kind: input, shape index: {}]   ;;  %s560_s1 = inlined_call_operand.vmem [shape: f32[2,32,1], index: 1, kind: output, shape index: {}]  }
   0x1   :  { %8 = vsyncpa [#allocation3 + $0x1], 0  ;;  %s441_s6 = smov 0   ;;  %s443_s7 = smov 0  }
   0x2   :  { %s445_s8 = smov 0   ;;  %s447_s9 = smov 0  }
   0x3   :  { %s449_s10 = smov 0   ;;  %s451_s11 = smov 0  }
   0x4 LB: > { %s274_s12 = sadd.s32 4294967295, %s425_s11   ;;  %s26_s13 = sadd.s32 1, %s421_s10  ;;  %s425_s11 = sphi %s451_s11, %s14_s11   ;;  %s421_s10 = sphi %s449_s10, %s568_s10   ;;  %s417_s9 = sphi %s447_s9, %s567_s9   ;;  %s413_s8 = sphi %s445_s8, %s566_s8   ;;  %s409_s7 = sphi %s443_s7, %s565_s7   ;;  %s405_s6 = sphi %s441_s6, %s564_s6  }
   0x5   : > { %p28_p0 = scmp.ge.s32.totalorder %s26_s13, 2  ;;  %s35_s14 = sadd.s32 1, %s413_s8 }
   0x6   : > { %p42_p1 = scmp.ne.s32.totalorder %s413_s8, %s409_s7  ;;  %p43_p2 = scmp.eq.s32.totalorder %s425_s11, 0 }
   0x7   : > { %s570_s13 = smov (%p28_p0, %s26_s13), 0  ;;  %p48_p4 = scmp.ne.s32.totalorder %s409_s7, %s405_s6 }
   0x8   : > { %p477_p3 = por %p43_p2, %p42_p1  ;;  %s30_s16 = ssub.s32 %s421_s10, %s570_s13 }
   0x9   : > { %p49_p5 = scmp.eq.s32.totalorder %s274_s12, 0  ;;  %p33_p6 = scmp.eq.s32.totalorder %s30_s16, 0 }
   0xa   : > { %p295_p8 = scmp.lt.s32.totalorder %s425_s11, 2  ;;  %s98_s19 = sand.u32 1, %s413_s8  }
   0xb   : > { %p484_p7 = por %p49_p5, %p48_p4  ;;  %s287_s20 = sshll.u32 %s421_s10, 10 }
   0xc   : > { %s490_s18 = scalar_select %p33_p6, %s413_s8, %s35_s14  }
   0xd   : > { %s278_s21 = sshll.u32 %s98_s19, 6  ;;  %s110_s24 = scalar_lea.hbm %s559_s0, %s287_s20 }
   0xe   : > { %s102_s25 = scalar_lea.vmem [#allocation2], %s278_s21  ;;  %p499_p9 = pnand %p295_p8, %p477_p3 }
   0xf   : > { %s111_s26 = sshll.u32 %s102_s25, 4  ;;  %s99_s28 = scalar_lea.sflag [#allocation3], %s98_s19  ;;  %s112_s26 = int_to_ptr.vmem [resolvable:$true] %s111_s26 }
  0x10   : > { %p349_p10 = pneg %p499_p9  ;;  %s360_s29 = scalar_lea.vmem %s112_s26, 1024 }
  0x11   : > { %p361_p11 = scmp.ne.s32.totalorder %s112_s26, %s360_s29  ;;  %s427_s30 = smov [#allocation2]  }
  0x12   : > { %s365_s2 = sshll.u32 %s427_s30, 4  ;;  %s366_s2 = int_to_ptr.vmem [resolvable:$false] %s365_s2 }
  0x13   : > { %p363_p12 = pnand %p361_p11, %p349_p10  ;;  %s367_s3 = scalar_lea.vmem %s366_s2, 2048 }
  0x14   : > { %p368_p0 = scmp.lt.s32.totalorder %s112_s26, %s366_s2  ;;  %p369_p1 = scmp.lt.s32.totalorder %s367_s3, %s360_s29 }
  0x15   : > { %p364_p13 = pneg %p363_p12 }
  0x16   : > { %p370_p2 = por %p369_p1, %p368_p0 }
  0x18   : > { %p371_p3 = pnand %p370_p2, %p364_p13 }
  0x1a   : > { %374 = shalt.err (!%p371_p3)
}
  0x1b   : > { %s428_s4 = smov 256   ;;  %s429_s5 = smov 16  }
  0x1c   : > { %294 = dma.hbm_to_vmem [thread:$0]  (!%p499_p9), %s110_s24, 1024, %s112_s26, %s99_s28, %s428_s4, %s428_s4, %s429_s5  }
  0x1d   : > { %p281_p4 = scmp.ge.s32.totalorder %s425_s11, 1  ;;  %p119_p5 = scmp.lt.s32.totalorder %s425_s11, 3 }
  0x1f   : > { %p120_p6 = pnand %p281_p4, %p119_p5 }
  0x20   : > { %s125_s6 = sand.u32 (!%p120_p6), 1, %s409_s7  }
  0x21   : > { %123 = sbr.rel (%p120_p6) target bundleno = 188 (0xbc), region = 24  ;;  %s282_s12 = sshll.u32 (!%p120_p6), %s125_s6, 6 }
  0x22   : > { %s126_s14 = scalar_lea.sflag (!%p120_p6), [#allocation3], %s125_s6  ;;  %s129_s15 = scalar_lea.vmem (!%p120_p6), [#allocation2], %s282_s12 }
  0x26   : > { %400 = dma.done.wait (%p484_p7), %s126_s14, 1024  }
  0x27   : > { %402 = vsyncadd (%p484_p7), %s126_s14, 4294966272  ;;  %p149_p8 = scmp.lt.s32.totalorder %s417_s9, 1  ;;  %vm158_vm0 = vcmask 7168   ;;  %v430_v0 = vmov 0.0   ;;  %v167_v1 = vld [vmem:[%s129_s15 + $0x20] sm:$0xff]  ;;  %v168_v2 = vld [vmem:[%s129_s15 + $0x28] sm:$0xff] }
  0x28   : > { %v163_v3 = vld [vmem:[%s129_s15] sm:$0xff]  ;;  %v181_v4 = vadd.f32 %v168_v2, %v167_v1  ;;  %v164_v5 = vld [vmem:[%s129_s15 + $0x8] sm:$0xff]  ;;  %v169_v6 = vld [vmem:[%s129_s15 + $0x30] sm:$0xff] }
  0x29   : > { %s572_s9 = smov (!%p149_p8, %s417_s9), 1  ;;  %v170_v7 = vld [vmem:[%s129_s15 + $0x38] sm:$0xff]  ;;  %v175_v8 = vadd.f32 %v164_v5, %v163_v3  ;;  %v165_v9 = vld [vmem:[%s129_s15 + $0x10] sm:$0xff] }
  0x2a   : > { %s288_s16 = sshll.u32 %s572_s9, 5  ;;  %v166_v10 = vld [vmem:[%s129_s15 + $0x18] sm:$0xff]  ;;  %182 = vadd.xlane.f32.xlu1 %v181_v4  ;;  %v184_v11 = vadd.f32 %v170_v7, %v169_v6 }
  0x2b   : > { %s519_s21 = scalar_lea.vmem %s560_s1, %s288_s16  ;;  %176 = vadd.xlane.f32.xlu0 %v175_v8  ;;  %v178_v12 = vadd.f32 %v166_v10, %v165_v9 }
  0x2c   : > { %161 = vst.msk [vmem:[%s519_s21 + $0x10] sm:$0xff] %vm158_vm0, %v430_v0  ;;  %159 = vst.msk [vmem:[%s519_s21] sm:$0xff] %vm158_vm0, %v430_v0 }
  0x2d   : > { %160 = vst.msk [vmem:[%s519_s21 + $0x8] sm:$0xff] %vm158_vm0, %v430_v0  ;;  %162 = vst.msk [vmem:[%s519_s21 + $0x18] sm:$0xff] %vm158_vm0, %v430_v0 }
  0x2e   : > { %185 = vadd.xlane.f32.xlu1 %v184_v11 }
  0x2f   : > { %179 = vadd.xlane.f32.xlu0 %v178_v12 }
  0x33   : > { %v173_v13 = vld [vmem:[%s519_s21 + $0x10] sm:$0xff]  ;;  %v171_v14 = vld [vmem:[%s519_s21] sm:$0xff] }
  0x34   : > { %v174_v19 = vld [vmem:[%s519_s21 + $0x18] sm:$0xff]  ;;  %v172_v20 = vld [vmem:[%s519_s21 + $0x8] sm:$0xff] }
  0xb3   : > { %v183_v15 = vpop.xlane.xlu1 %182 }
  0xb4   : > { %v189_v16 = vadd.f32 %v183_v15, %v173_v13  ;;  %v177_v17 = vpop.xlane.xlu0 %176 }
  0xb5   : > { %v187_v18 = vadd.f32 %v177_v17, %v171_v14 }
  0xb6   : > { %194 = vst.msk [vmem:[%s519_s21 + $0x10] sm:$0xff] %vm158_vm0, %v189_v16 }
  0xb7   : > { %192 = vst.msk [vmem:[%s519_s21] sm:$0xff] %vm158_vm0, %v187_v18  ;;  %v186_v21 = vpop.xlane.xlu1 %185 }
  0xb8   : > { %v190_v22 = vadd.f32 %v186_v21, %v174_v19  ;;  %v180_v23 = vpop.xlane.xlu0 %179 }
  0xb9   : > { %v188_v24 = vadd.f32 %v180_v23, %v172_v20 }
  0xba   : > { %195 = vst.msk [vmem:[%s519_s21 + $0x18] sm:$0xff] %vm158_vm0, %v190_v22 }
  0xbb   : > { %193 = vst.msk [vmem:[%s519_s21 + $0x8] sm:$0xff] %vm158_vm0, %v188_v24 }
  0xbc PF: > { %s14_s11 = sadd.s32 1, %s425_s11   ;;  %s564_s6 = smov %s409_s7 }
  0xbd   : > { %p11_p7 = scmp.ge.s32.totalorder %s14_s11, 4   ;;  %s565_s7 = smov %s413_s8 }
  0xbe   : > { %s566_s8 = smov %s490_s18  ;;  %s567_s9 = smov %s421_s10 }
  0xbf   : > { %s568_s10 = smov %s570_s13  ;;  %13 = sbr.rel (!%p11_p7) target bundleno = 4 (0x4), region = 68 }
  0xc4   :  { %217 = vsyncpa [#allocation3], 1 }
  0xc5   :  { %219 = vsyncpa [#allocation3 + $0x1], 1 }

</bundles_post_ra>
